<compile_context>
chip_gen: v6e
topology: v6e:2x2x1
jax: 0.10.0
libtpu: 0.0.40
codegen_flags: <defaults>
</compile_context>

<pallas_src>
import functools

import jax
import jax.numpy as jnp
from jax import lax
from jax.experimental import pallas as pl
from jax.experimental.pallas import tpu as pltpu

LANE = 128
MAX_TILE_ROWS = 2048  # (2048, 128) f32 = 1 MiB per input block


def _round_up(x: int, m: int) -> int:
    return ((x + m - 1) // m) * m


def _elementwise_loss(d, loss_type: str):
    if loss_type == "mse":
        return d * d
    if loss_type == "l1":
        return jnp.abs(d)
    if loss_type == "huber":
        # PyTorch F.huber_loss default delta = 1.0
        ad = jnp.abs(d)
        return jnp.where(ad < 1.0, 0.5 * d * d, ad - 0.5)
    raise ValueError(f"Unsupported loss type: {loss_type}")


def _make_kernel(loss_type: str, tile_rows: int, n_rows: int, has_mask: bool):
    need_tail_mask = (n_rows % tile_rows) != 0

    def _body(p, t, m, out_ref, i):
        d = p.astype(jnp.float32) - t.astype(jnp.float32)
        l = _elementwise_loss(d, loss_type)
        if m is not None:
            l = l * m.astype(jnp.float32)
        if need_tail_mask:
            # Zero out rows past the true row count (last block may read
            # undefined padded data).
            row = i * tile_rows + lax.broadcasted_iota(
                jnp.int32, (tile_rows, LANE), 0)
            l = jnp.where(row < n_rows, l, 0.0)
        # Fold (tile_rows, 128) -> (8, 128) partial sums with pure VPU adds
        # (no cross-lane XLU work, lane-dense output store).
        out_ref[...] = l.reshape(tile_rows // 8, 8, LANE).sum(axis=0)

    if has_mask:
        def kernel(p_ref, t_ref, m_ref, out_ref):
            _body(p_ref[...], t_ref[...], m_ref[...], out_ref, pl.program_id(0))
    else:
        def kernel(p_ref, t_ref, out_ref):
            _body(p_ref[...], t_ref[...], None, out_ref, pl.program_id(0))
    return kernel


@functools.partial(jax.jit, static_argnames=("loss_type",))
def ddpm_loss(predicted_noise, target_noise, mask=None, loss_type: str = "mse"):
    """Pallas implementation of DDPMLoss.forward (returns scalar f32)."""
    loss_type = loss_type.lower()
    numel = predicted_noise.size

    p = predicted_noise.reshape(-1)
    t = target_noise.reshape(-1)
    has_mask = mask is not None
    if has_mask:
        if mask.shape != predicted_noise.shape:
            mask = jnp.broadcast_to(mask, predicted_noise.shape)
        m = mask.reshape(-1)

    # Lane-dense (rows, 128) view.  Only the sub-128 remainder is padded
    # (padded pred/targ are 0 -> padded loss is exactly 0 for mse/l1/huber).
    rem = numel % LANE
    if rem:
        pad = LANE - rem
        p = jnp.pad(p, (0, pad))
        t = jnp.pad(t, (0, pad))
        if has_mask:
            m = jnp.pad(m, (0, pad))
    n_rows = p.size // LANE
    p = p.reshape(n_rows, LANE)
    t = t.reshape(n_rows, LANE)
    if has_mask:
        m = m.reshape(n_rows, LANE)

    # Block rows: as large as MAX_TILE_ROWS, rounded to a multiple of 16 so
    # bf16 (16, 128) sublane packing is always satisfied.
    tile_rows = min(MAX_TILE_ROWS, _round_up(n_rows, 16))
    n_tiles = pl.cdiv(n_rows, tile_rows)

    in_spec = pl.BlockSpec((tile_rows, LANE), lambda i: (i, 0))
    out_spec = pl.BlockSpec((8, LANE), lambda i: (i, 0))

    kernel = _make_kernel(loss_type, tile_rows, n_rows, has_mask)
    inputs = (p, t, m) if has_mask else (p, t)

    partials = pl.pallas_call(
        kernel,
        out_shape=jax.ShapeDtypeStruct((n_tiles * 8, LANE), jnp.float32),
        grid_spec=pltpu.PrefetchScalarGridSpec(
            num_scalar_prefetch=0,
            grid=(n_tiles,),
            in_specs=[in_spec] * len(inputs),
            out_specs=out_spec,
        ),
        compiler_params=pltpu.CompilerParams(
            dimension_semantics=("parallel",),  # per-tile partials -> both TCs on v7x
        ),
    )(*inputs)

    # PyTorch `.mean()`: divide by element count, not mask sum.
    return jnp.sum(partials) / jnp.float32(numel)


def _reference(pred, target, mask=None, loss_type="mse"):
    d = pred.astype(jnp.float32) - target.astype(jnp.float32)
    if loss_type == "mse":
        l = d * d
    elif loss_type == "l1":
        l = jnp.abs(d)
    else:
        ad = jnp.abs(d)
        l = jnp.where(ad < 1.0, 0.5 * d * d, ad - 0.5)
    if mask is not None:
        l = l * mask.astype(jnp.float32)
    return jnp.mean(l)


if __name__ == "__main__":
    key = jax.random.PRNGKey(0)
    k1, k2, k3, k4, k5 = jax.random.split(key, 5)

    ok = True

    # Small NCHW-like noise tensors: batch=2, channels=4, spatial=16x16.
    shape = (2, 4, 16, 16)
    pred = jax.random.normal(k1, shape, dtype=jnp.float32)
    targ = jax.random.normal(k2, shape, dtype=jnp.float32)
    mask = (jax.random.uniform(k3, shape) > 0.5).astype(jnp.float32)

    for loss_type in ("mse", "l1", "huber"):
        for m in (None, mask):
            out = jax.block_until_ready(ddpm_loss(pred, targ, m, loss_type=loss_type))
            ref = _reference(pred, targ, m, loss_type)
            if not jnp.allclose(out, ref, rtol=2e-5, atol=1e-6):
                ok = False
                print(f"MISMATCH {loss_type} mask={m is not None}: {out} vs {ref}")

    # Ragged numel + native bf16 inputs (exercises in-kernel tail masking and
    # the no-upcast / no-mask fast path).
    rshape = (3, 5, 7, 11)
    rp = jax.random.normal(k4, rshape, dtype=jnp.bfloat16)
    rt = jax.random.normal(k5, rshape, dtype=jnp.bfloat16)
    out = jax.block_until_ready(ddpm_loss(rp, rt, None, loss_type="mse"))
    ref = _reference(rp, rt, None, "mse")
    if not jnp.allclose(out, ref, rtol=2e-5, atol=1e-6):
        ok = False
        print(f"MISMATCH ragged bf16 mse: {out} vs {ref}")

    if ok:
        print("KERNEL_OK")
</pallas_src>

<mosaic_0001>
module attributes {stable_mosaic.version = 11 : i64} {
  func.func @kernel(%arg0: i32, %arg1: memref<16x128xf32, #tpu.memory_space<vmem>>, %arg2: memref<16x128xf32, #tpu.memory_space<vmem>>, %arg3: memref<8x128xf32, #tpu.memory_space<vmem>>) attributes {dimension_semantics = [#tpu.dimension_semantics<parallel>], iteration_bounds = array<i64: 1>, scalar_prefetch = 0 : i64, scratch_operands = 0 : i64, tpu.core_type = #tpu.core_type<tc>, window_params = [{transform_indices = @transform_0, window_bounds = array<i64: 16, 128>}, {transform_indices = @transform_1, window_bounds = array<i64: 16, 128>}, {transform_indices = @transform_2, window_bounds = array<i64: 8, 128>}]} {
    %c0 = arith.constant 0 : index
    %c0_0 = arith.constant 0 : index
    %0 = vector.load %arg1[%c0, %c0_0] : memref<16x128xf32, #tpu.memory_space<vmem>>, vector<16x128xf32>
    %c0_1 = arith.constant 0 : index
    %c0_2 = arith.constant 0 : index
    %1 = vector.load %arg2[%c0_1, %c0_2] : memref<16x128xf32, #tpu.memory_space<vmem>>, vector<16x128xf32>
    %2 = arith.subf %0, %1 : vector<16x128xf32>
    %3 = arith.mulf %2, %2 : vector<16x128xf32>
    %4 = vector.shape_cast %3 : vector<16x128xf32> to vector<2x8x128xf32>
    %cst = arith.constant dense<0.000000e+00> : vector<8x128xf32>
    %5 = vector.multi_reduction <add>, %4, %cst [0] : vector<2x8x128xf32> to vector<8x128xf32>
    %c0_3 = arith.constant 0 : index
    %c0_4 = arith.constant 0 : index
    %6 = vector.load %arg3[%c0_3, %c0_4] : memref<8x128xf32, #tpu.memory_space<vmem>>, vector<8x128xf32>
    tpu.vector_store %arg3[%c0_3, %c0_4], %5 {strides = array<i32>} : memref<8x128xf32, #tpu.memory_space<vmem>>, vector<8x128xf32>,
    return
  }
  func.func @transform_0(%arg0: i32) -> (i32, i32) {
    %c0_i32 = arith.constant 0 : i32
    %c0_i32_0 = arith.constant 0 : i32
    return %arg0, %c0_i32 : i32, i32
  }
  func.func @transform_1(%arg0: i32) -> (i32, i32) {
    %c0_i32 = arith.constant 0 : i32
    %c0_i32_0 = arith.constant 0 : i32
    return %arg0, %c0_i32 : i32, i32
  }
  func.func @transform_2(%arg0: i32) -> (i32, i32) {
    %c0_i32 = arith.constant 0 : i32
    %c0_i32_0 = arith.constant 0 : i32
    return %arg0, %c0_i32 : i32, i32
  }
}

</mosaic_0001>

<bundles_post_ra>
// kernel: ddpm_loss.1
= control target key start
LH: loop header
LB: loop body
LE: loop exit
PB: predicated region body
PF: predicated region fallthrough
CT: control target
= control target key end

     0   :  { %s55_s0 = inlined_call_operand.vmem [shape: f32[16,128], index: 0, kind: input, shape index: {}]   ;;  %s56_s1 = inlined_call_operand.vmem [shape: f32[16,128], index: 1, kind: input, shape index: {}]   ;;  %s57_s2 = inlined_call_operand.vmem [shape: f32[8,128], index: 2, kind: output, shape index: {}]  }
   0x1   :  { %v11_v0 = vld [vmem:[%s55_s0] sm:$0xff]  ;;  %v12_v1 = vld [vmem:[%s55_s0 + $0x8] sm:$0xff] }
   0x2   :  { %v13_v2 = vld [vmem:[%s56_s1] sm:$0xff]  ;;  %v14_v3 = vld [vmem:[%s56_s1 + $0x8] sm:$0xff] }
   0x3   :  { %v15_v4 = vsub.f32 %v11_v0, %v13_v2  ;;  %v16_v5 = vsub.f32 %v12_v1, %v14_v3 }
   0x5   :  { %v17_v6 = vmul.f32 %v15_v4, %v15_v4  ;;  %v18_v7 = vmul.f32 %v16_v5, %v16_v5 }
   0x7   :  { %v19_v8 = vadd.f32 %v18_v7, %v17_v6 }
   0x9   :  { %20 = vst [vmem:[%s57_s2] sm:$0xff] %v19_v8 }

</bundles_post_ra>
